<compile_context>
chip_gen: v5e
topology: v5e:2x2
jax: 0.10.0
libtpu: 0.0.40
codegen_flags: <defaults>
</compile_context>

<pallas_src>
import functools

import jax
import jax.numpy as jnp
from jax.experimental import pallas as pl
from jax.experimental.pallas import tpu as pltpu


def _round_up(n, m):
    return (n + m - 1) // m * m


def _xlstm_stack_kernel(*refs, has_hidden):
    """One grid step == one xLSTMCell layer.

    xh_ref: persistent bf16 VMEM scratch (Bp, 2*Hp) holding
    [activation | recurrent h], so a single MXU matmul against the stacked
    (2*Hp, 4*Hp) bf16 weight block computes i2h(act) + h2h(h) with one shared
    f32 accumulator.  The new h written back into the activation slot feeds
    layer l+1 without touching HBM.  Layer 0's real x @ Wi0 contribution
    arrives pre-computed (f32) via xproj_ref; its Wi slot in the stacked
    weights is zero.
    """
    if has_hidden:
        (xproj_ref, w_ref, b_ref, h_in_ref, c_in_ref,
         h_out_ref, c_out_ref, xh_ref) = refs
    else:
        xproj_ref, w_ref, b_ref, h_out_ref, c_out_ref, xh_ref = refs
        h_in_ref = c_in_ref = None

    layer = pl.program_id(0)
    Bp, two_hp = xh_ref.shape
    Hp = two_hp // 2

    # Initialise the activation scratch exactly once (layer 0).  The layer-0
    # activation half contracts against zero Wi rows, but must be finite so
    # stale VMEM (possible NaN bit patterns) cannot poison the accumulate.
    @pl.when(layer == 0)
    def _():
        if has_hidden:
            xh_ref[:, :Hp] = jnp.zeros((Bp, Hp), xh_ref.dtype)
        else:
            # With no provided hidden, every layer's recurrent h is zero too,
            # so zero the whole scratch once and never touch the h half again.
            xh_ref[...] = jnp.zeros((Bp, 2 * Hp), xh_ref.dtype)

    if has_hidden:
        xh_ref[:, Hp:] = h_in_ref[0].astype(xh_ref.dtype)
        c_prev = c_in_ref[0].astype(jnp.float32)
    else:
        c_prev = jnp.zeros((Bp, Hp), jnp.float32)

    # gates = [act | h] @ [Wi ; Wh]   (bf16 x bf16 -> f32 accumulate), + bias.
    gates = jnp.dot(xh_ref[...], w_ref[0], preferred_element_type=jnp.float32)
    gates = gates + b_ref[0]
    # Layer 0 additionally receives the hoisted full-precision x @ Wi0 term.
    gates = gates + (layer == 0).astype(jnp.float32) * xproj_ref[...]

    # Gate slices start at multiples of Hp (a multiple of 128) -> lane-aligned.
    ingate = jax.nn.sigmoid(gates[:, 0 * Hp:1 * Hp])
    forgetgate = jax.nn.sigmoid(gates[:, 1 * Hp:2 * Hp])
    cellgate = jnp.tanh(gates[:, 2 * Hp:3 * Hp])
    outgate = jax.nn.sigmoid(gates[:, 3 * Hp:4 * Hp])

    c_new = forgetgate * c_prev + ingate * cellgate
    h_new = outgate * jnp.tanh(c_new)

    h_out_ref[0] = h_new.astype(h_out_ref.dtype)
    c_out_ref[0] = c_new.astype(c_out_ref.dtype)

    # Activation for the next layer (bf16 shadow, exactly Hp lanes, lane-dense).
    xh_ref[:, :Hp] = h_new.astype(xh_ref.dtype)


def pack_params(params, input_dim, hidden_dim):
    """One-time prep (NOT in the hot path).

    Per layer: transpose to (in, 4H) layout, pad each of the 4 gate blocks to
    Hp = round_up(H, 128) lanes, pad the contraction axis to Hp, concatenate
    [Wi ; Wh] -> (2*Hp, 4*Hp) bf16, pre-sum biases (f32), stack layers.
    Layer 0's Wi slot is left zero: its x @ Wi0 contribution is computed by
    one f32 GEMM in the wrapper (Wi0 is kept separately, gate-padded).
    """
    H = hidden_dim
    Hp = _round_up(H, 128)
    L = len(params)

    def pad_gate_cols(w, rows_to, dtype):
        rows = w.shape[0]
        w4 = w.reshape(rows, 4, H)
        w4 = jnp.pad(w4, ((0, rows_to - rows), (0, 0), (0, Hp - H)))
        return w4.reshape(rows_to, 4 * Hp).astype(dtype)

    w_blocks, b_blocks = [], []
    for i, p in enumerate(params):
        if i == 0:
            wi = jnp.zeros((Hp, 4 * Hp), jnp.bfloat16)        # hoisted into xproj
        else:
            wi = pad_gate_cols(p["w_i2h"].T, Hp, jnp.bfloat16)  # in_dim == H here
        wh = pad_gate_cols(p["w_h2h"].T, Hp, jnp.bfloat16)
        w_blocks.append(jnp.concatenate([wi, wh], axis=0))       # (2Hp, 4Hp)
        b = (p["b_i2h"] + p["b_h2h"]).astype(jnp.float32).reshape(4, H)
        b = jnp.pad(b, ((0, 0), (0, Hp - H))).reshape(1, 4 * Hp)
        b_blocks.append(b)

    # Layer-0 input projection weight, full f32 precision, gate-padded columns.
    wi0 = params[0]["w_i2h"].T.astype(jnp.float32).reshape(input_dim, 4, H)
    wi0 = jnp.pad(wi0, ((0, 0), (0, 0), (0, Hp - H))).reshape(input_dim, 4 * Hp)

    return {
        "W": jnp.stack(w_blocks),        # (L, 2Hp, 4Hp) bf16
        "b": jnp.stack(b_blocks),        # (L, 1, 4Hp)   f32
        "Wi0": wi0,                      # (input_dim, 4Hp) f32
        "input_dim": input_dim, "hidden_dim": hidden_dim,
        "Hp": Hp, "L": L,
    }


def xlstm_forward(x, packed, hidden=None):
    """Stacked xLSTM forward via one fused Pallas kernel.

    x: (B, input_dim). Returns (output, [(h, c) per layer]) like the module.
    """
    B, in_dim = x.shape
    L, Hp, H = packed["L"], packed["Hp"], packed["hidden_dim"]
    Bp = _round_up(B, 8)
    out_dtype = x.dtype
    itemsize = jnp.dtype(out_dtype).itemsize
    has_hidden = hidden is not None

    # Hoisted layer-0 input projection: one small f32 XLA GEMM, gate-padded.
    xproj = jnp.dot(x.astype(jnp.float32), packed["Wi0"])         # (B, 4Hp)
    xproj = jnp.pad(xproj, ((0, Bp - B), (0, 0)))                 # (Bp, 4Hp)

    layer_state_spec = pl.BlockSpec((1, Bp, Hp), lambda l: (l, 0, 0))
    in_specs = [
        pl.BlockSpec((Bp, 4 * Hp), lambda l: (0, 0)),             # xproj (resident)
        pl.BlockSpec((1, 2 * Hp, 4 * Hp), lambda l: (l, 0, 0)),   # per-layer [Wi;Wh]
        pl.BlockSpec((1, 1, 4 * Hp), lambda l: (l, 0, 0)),        # per-layer bias
    ]
    args = [xproj, packed["W"], packed["b"]]

    if has_hidden:
        h_in = jnp.stack([jnp.pad(h.astype(out_dtype), ((0, Bp - B), (0, Hp - H)))
                          for (h, _) in hidden])
        c_in = jnp.stack([jnp.pad(c.astype(out_dtype), ((0, Bp - B), (0, Hp - H)))
                          for (_, c) in hidden])
        in_specs += [layer_state_spec, layer_state_spec]
        args += [h_in, c_in]

    # Explicit VMEM budget: double-buffered bf16 weight block + resident xproj
    # + bf16 activation scratch + state buffers + headroom.
    w_block_bytes = 2 * Hp * 4 * Hp * 2
    vmem_bytes = (2 * w_block_bytes
                  + Bp * 4 * Hp * 4
                  + Bp * 2 * Hp * 2
                  + 8 * Bp * Hp * itemsize
                  + 4 * 4 * Hp * 4
                  + (4 << 20))
    vmem_bytes = int(max(16 << 20, min(vmem_bytes, 64 << 20)))

    cost = pl.CostEstimate(
        flops=int(2 * L * Bp * (2 * Hp) * (4 * Hp) + 10 * L * Bp * Hp),
        transcendentals=int(5 * L * Bp * Hp),
        bytes_accessed=int(L * w_block_bytes + L * 4 * Hp * 4 + Bp * 4 * Hp * 4
                           + (4 if has_hidden else 2) * L * Bp * Hp * itemsize))

    kernel = functools.partial(_xlstm_stack_kernel, has_hidden=has_hidden)
    h_out, c_out = pl.pallas_call(
        kernel,
        out_shape=(jax.ShapeDtypeStruct((L, Bp, Hp), out_dtype),
                   jax.ShapeDtypeStruct((L, Bp, Hp), out_dtype)),
        grid=(L,),
        in_specs=in_specs,
        out_specs=(layer_state_spec, layer_state_spec),
        scratch_shapes=[pltpu.VMEM((Bp, 2 * Hp), jnp.bfloat16)],
        compiler_params=pltpu.CompilerParams(
            # Layer axis is a recurrence (activation carried in VMEM scratch).
            dimension_semantics=("arbitrary",),
            vmem_limit_bytes=vmem_bytes),
        cost_estimate=cost,
    )(*args)

    out = h_out[L - 1, :B, :H]
    new_hidden = [(h_out[l, :B, :H], c_out[l, :B, :H]) for l in range(L)]
    return out, new_hidden


def init_params(key, input_dim, hidden_dim, num_layers, dtype=jnp.float32):
    """PyTorch-style uniform(-1/sqrt(fan_in), +1/sqrt(fan_in)), nn.Linear layout."""
    params = []
    for i in range(num_layers):
        in_dim = input_dim if i == 0 else hidden_dim
        key, k1, k2, k3, k4 = jax.random.split(key, 5)
        bound_i = 1.0 / (in_dim ** 0.5)
        bound_h = 1.0 / (hidden_dim ** 0.5)
        params.append({
            "w_i2h": jax.random.uniform(k1, (4 * hidden_dim, in_dim),
                                        dtype, -bound_i, bound_i),
            "b_i2h": jax.random.uniform(k2, (4 * hidden_dim,),
                                        dtype, -bound_i, bound_i),
            "w_h2h": jax.random.uniform(k3, (4 * hidden_dim, hidden_dim),
                                        dtype, -bound_h, bound_h),
            "b_h2h": jax.random.uniform(k4, (4 * hidden_dim,),
                                        dtype, -bound_h, bound_h),
        })
    return params


def _reference_forward(x, params, hidden=None):
    """Plain-JAX f32 reference of the same semantics (sanity check)."""
    B = x.shape[0]
    H = params[0]["w_h2h"].shape[1]
    if hidden is None:
        hidden = [(jnp.zeros((B, H), x.dtype), jnp.zeros((B, H), x.dtype))
                  for _ in params]
    new_hidden = []
    for p, (h, c) in zip(params, hidden):
        gates = x @ p["w_i2h"].T + p["b_i2h"] + h @ p["w_h2h"].T + p["b_h2h"]
        i, f, g, o = jnp.split(gates, 4, axis=1)
        i, f, g, o = (jax.nn.sigmoid(i), jax.nn.sigmoid(f),
                      jnp.tanh(g), jax.nn.sigmoid(o))
        c = f * c + i * g
        h = o * jnp.tanh(c)
        x = h
        new_hidden.append((h, c))
    return x, new_hidden


if __name__ == "__main__":
    B, INPUT_DIM, HIDDEN_DIM, NUM_LAYERS = 4, 16, 32, 2

    key = jax.random.PRNGKey(0)
    key, xk = jax.random.split(key)
    x = jax.random.normal(xk, (B, INPUT_DIM), dtype=jnp.float32)

    params = init_params(key, INPUT_DIM, HIDDEN_DIM, NUM_LAYERS)
    packed = pack_params(params, INPUT_DIM, HIDDEN_DIM)

    # bf16 weights / activations inside the kernel -> loosened tolerance.
    TOL = dict(atol=3e-2, rtol=3e-2)

    # ---- hidden = None path (in-kernel zero init, no h/c HBM streams) ----
    out, new_hidden = xlstm_forward(x, packed)
    out = jax.block_until_ready(out)
    for h, c in new_hidden:
        jax.block_until_ready(h)
        jax.block_until_ready(c)

    ref_out, ref_hidden = _reference_forward(x, params)
    assert out.shape == (B, HIDDEN_DIM)
    assert jnp.allclose(out, ref_out, **TOL)
    for (h, c), (rh, rc) in zip(new_hidden, ref_hidden):
        assert jnp.allclose(h, rh, **TOL)
        assert jnp.allclose(c, rc, **TOL)

    # ---- explicitly provided hidden state path ----
    hidden0 = []
    for _ in range(NUM_LAYERS):
        key, k1, k2 = jax.random.split(key, 3)
        hidden0.append((0.5 * jax.random.normal(k1, (B, HIDDEN_DIM), jnp.float32),
                        0.5 * jax.random.normal(k2, (B, HIDDEN_DIM), jnp.float32)))
    out2, new_hidden2 = xlstm_forward(x, packed, hidden=hidden0)
    out2 = jax.block_until_ready(out2)
    ref_out2, ref_hidden2 = _reference_forward(x, params, hidden0)
    assert jnp.allclose(out2, ref_out2, **TOL)
    for (h, c), (rh, rc) in zip(new_hidden2, ref_hidden2):
        assert jnp.allclose(h, rh, **TOL)
        assert jnp.allclose(c, rc, **TOL)

    print("KERNEL_OK")
</pallas_src>

<mosaic_0001>
module attributes {stable_mosaic.version = 11 : i64} {
  func.func @_xlstm_stack_kernel(%arg0: i32, %arg1: memref<8x512xf32, #tpu.memory_space<vmem>>, %arg2: memref<1x256x512xbf16, #tpu.memory_space<vmem>>, %arg3: memref<1x1x512xf32, #tpu.memory_space<vmem>>, %arg4: memref<1x8x128xf32, #tpu.memory_space<vmem>>, %arg5: memref<1x8x128xf32, #tpu.memory_space<vmem>>, %arg6: memref<8x256xbf16, #tpu.memory_space<vmem>>) attributes {dimension_semantics = [#tpu.dimension_semantics<arbitrary>], iteration_bounds = array<i64: 2>, scalar_prefetch = 0 : i64, scratch_operands = 1 : i64, tpu.core_type = #tpu.core_type<tc>, window_params = [{pipeline_mode = #tpu.pipeline_mode<synchronous>, transform_indices = @transform_0, window_bounds = array<i64: 8, 512>}, {transform_indices = @transform_1, window_bounds = array<i64: 1, 256, 512>}, {transform_indices = @transform_2, window_bounds = array<i64: 1, 1, 512>}, {transform_indices = @transform_3, window_bounds = array<i64: 1, 8, 128>}, {transform_indices = @transform_4, window_bounds = array<i64: 1, 8, 128>}]} {
    %c0_i32 = arith.constant 0 : i32
    %0 = arith.cmpi eq, %arg0, %c0_i32 : i32
    %1 = arith.extui %0 : i1 to i32
    %c0_i32_0 = arith.constant 0 : i32
    %2 = arith.cmpi ne, %1, %c0_i32_0 : i32
    scf.if %2 {
      %cst_23 = arith.constant 0.000000e+00 : bf16
      %52 = vector.broadcast %cst_23 : bf16 to vector<8x256xbf16>
      %c0_24 = arith.constant 0 : index
      %c0_25 = arith.constant 0 : index
      %53 = vector.load %arg6[%c0_24, %c0_25] : memref<8x256xbf16, #tpu.memory_space<vmem>>, vector<8x256xbf16>
      tpu.vector_store %arg6[%c0_24, %c0_25], %52 {strides = array<i32>} : memref<8x256xbf16, #tpu.memory_space<vmem>>, vector<8x256xbf16>,
    } else {
    }
    %cst = arith.constant 0.000000e+00 : f32
    %3 = vector.broadcast %cst : f32 to vector<8x128xf32>
    %c0 = arith.constant 0 : index
    %c0_1 = arith.constant 0 : index
    %4 = vector.load %arg6[%c0, %c0_1] : memref<8x256xbf16, #tpu.memory_space<vmem>>, vector<8x256xbf16>
    %c0_2 = arith.constant 0 : index
    %c0_3 = arith.constant 0 : index
    %c0_4 = arith.constant 0 : index
    %5 = vector.load %arg2[%c0_2, %c0_3, %c0_4] : memref<1x256x512xbf16, #tpu.memory_space<vmem>>, vector<1x256x512xbf16>
    %6 = vector.shape_cast %5 : vector<1x256x512xbf16> to vector<256x512xbf16>
    %cst_5 = arith.constant dense<0.000000e+00> : vector<8x512xf32>
    %7 = tpu.matmul %4, %6, %cst_5 {dimension_numbers = #tpu.dot_dimension_numbers<[1], [0], [0], [1], [0, 0, 1, 1], [], []>} : vector<8x256xbf16>, vector<256x512xbf16>, vector<8x512xf32> -> vector<8x512xf32>
    %c0_6 = arith.constant 0 : index
    %c0_7 = arith.constant 0 : index
    %c0_8 = arith.constant 0 : index
    %8 = vector.load %arg3[%c0_6, %c0_7, %c0_8] : memref<1x1x512xf32, #tpu.memory_space<vmem>>, vector<1x1x512xf32>
    %9 = vector.shape_cast %8 : vector<1x1x512xf32> to vector<1x512xf32>
    %10 = vector.broadcast %9 : vector<1x512xf32> to vector<8x512xf32>
    %11 = arith.addf %7, %10 : vector<8x512xf32>
    %c0_i32_9 = arith.constant 0 : i32
    %12 = arith.cmpi eq, %arg0, %c0_i32_9 : i32
    %13 = arith.extui %12 : i1 to i32
    %14 = arith.sitofp %13 : i32 to f32
    %c0_10 = arith.constant 0 : index
    %c0_11 = arith.constant 0 : index
    %15 = vector.load %arg1[%c0_10, %c0_11] : memref<8x512xf32, #tpu.memory_space<vmem>>, vector<8x512xf32>
    %16 = vector.broadcast %14 : f32 to vector<8x512xf32>
    %17 = arith.mulf %16, %15 : vector<8x512xf32>
    %18 = arith.addf %11, %17 : vector<8x512xf32>
    %19 = vector.extract_strided_slice %18 {offsets = [0, 0], sizes = [8, 128], strides = [1, 1]} : vector<8x512xf32> to vector<8x128xf32>
    %20 = arith.negf %19 : vector<8x128xf32>
    %21 = math.exp %20 : vector<8x128xf32>
    %cst_12 = arith.constant 1.000000e+00 : f32
    %22 = vector.broadcast %cst_12 : f32 to vector<8x128xf32>
    %23 = arith.addf %22, %21 : vector<8x128xf32>
    %24 = arith.divf %22, %23 : vector<8x128xf32>
    %25 = vector.extract_strided_slice %18 {offsets = [0, 128], sizes = [8, 128], strides = [1, 1]} : vector<8x512xf32> to vector<8x128xf32>
    %26 = arith.negf %25 : vector<8x128xf32>
    %27 = math.exp %26 : vector<8x128xf32>
    %cst_13 = arith.constant 1.000000e+00 : f32
    %28 = vector.broadcast %cst_13 : f32 to vector<8x128xf32>
    %29 = arith.addf %28, %27 : vector<8x128xf32>
    %30 = arith.divf %28, %29 : vector<8x128xf32>
    %31 = vector.extract_strided_slice %18 {offsets = [0, 256], sizes = [8, 128], strides = [1, 1]} : vector<8x512xf32> to vector<8x128xf32>
    %32 = math.tanh %31 : vector<8x128xf32>
    %33 = vector.extract_strided_slice %18 {offsets = [0, 384], sizes = [8, 128], strides = [1, 1]} : vector<8x512xf32> to vector<8x128xf32>
    %34 = arith.negf %33 : vector<8x128xf32>
    %35 = math.exp %34 : vector<8x128xf32>
    %cst_14 = arith.constant 1.000000e+00 : f32
    %36 = vector.broadcast %cst_14 : f32 to vector<8x128xf32>
    %37 = arith.addf %36, %35 : vector<8x128xf32>
    %38 = arith.divf %36, %37 : vector<8x128xf32>
    %39 = arith.mulf %30, %3 : vector<8x128xf32>
    %40 = arith.mulf %24, %32 : vector<8x128xf32>
    %41 = arith.addf %39, %40 : vector<8x128xf32>
    %42 = math.tanh %41 : vector<8x128xf32>
    %43 = arith.mulf %38, %42 : vector<8x128xf32>
    %c0_15 = arith.constant 0 : index
    %c0_16 = arith.constant 0 : index
    %c0_17 = arith.constant 0 : index
    %44 = vector.load %arg4[%c0_15, %c0_16, %c0_17] : memref<1x8x128xf32, #tpu.memory_space<vmem>>, vector<1x8x128xf32>
    %45 = vector.shape_cast %44 : vector<1x8x128xf32> to vector<8x128xf32>
    %46 = vector.shape_cast %43 : vector<8x128xf32> to vector<1x8x128xf32>
    tpu.vector_store %arg4[%c0_15, %c0_16, %c0_17], %46 {strides = array<i32>} : memref<1x8x128xf32, #tpu.memory_space<vmem>>, vector<1x8x128xf32>,
    %c0_18 = arith.constant 0 : index
    %c0_19 = arith.constant 0 : index
    %c0_20 = arith.constant 0 : index
    %47 = vector.load %arg5[%c0_18, %c0_19, %c0_20] : memref<1x8x128xf32, #tpu.memory_space<vmem>>, vector<1x8x128xf32>
    %48 = vector.shape_cast %47 : vector<1x8x128xf32> to vector<8x128xf32>
    %49 = vector.shape_cast %41 : vector<8x128xf32> to vector<1x8x128xf32>
    tpu.vector_store %arg5[%c0_18, %c0_19, %c0_20], %49 {strides = array<i32>} : memref<1x8x128xf32, #tpu.memory_space<vmem>>, vector<1x8x128xf32>,
    %50 = arith.truncf %43 : vector<8x128xf32> to vector<8x128xbf16>
    %c0_21 = arith.constant 0 : index
    %c0_22 = arith.constant 0 : index
    %51 = vector.load %arg6[%c0_21, %c0_22] : memref<8x256xbf16, #tpu.memory_space<vmem>>, vector<8x128xbf16>
    tpu.vector_store %arg6[%c0_21, %c0_22], %50 {strides = array<i32>} : memref<8x256xbf16, #tpu.memory_space<vmem>>, vector<8x128xbf16>,
    return
  }
  func.func @transform_0(%arg0: i32) -> (i32, i32) {
    %c0_i32 = arith.constant 0 : i32
    %c0_i32_0 = arith.constant 0 : i32
    %c0_i32_1 = arith.constant 0 : i32
    return %c0_i32, %c0_i32_0 : i32, i32
  }
  func.func @transform_1(%arg0: i32) -> (i32, i32, i32) {
    %c0_i32 = arith.constant 0 : i32
    %c0_i32_0 = arith.constant 0 : i32
    %c0_i32_1 = arith.constant 0 : i32
    return %arg0, %c0_i32, %c0_i32_0 : i32, i32, i32
  }
  func.func @transform_2(%arg0: i32) -> (i32, i32, i32) {
    %c0_i32 = arith.constant 0 : i32
    %c0_i32_0 = arith.constant 0 : i32
    %c0_i32_1 = arith.constant 0 : i32
    return %arg0, %c0_i32, %c0_i32_0 : i32, i32, i32
  }
  func.func @transform_3(%arg0: i32) -> (i32, i32, i32) {
    %c0_i32 = arith.constant 0 : i32
    %c0_i32_0 = arith.constant 0 : i32
    %c0_i32_1 = arith.constant 0 : i32
    return %arg0, %c0_i32, %c0_i32_0 : i32, i32, i32
  }
  func.func @transform_4(%arg0: i32) -> (i32, i32, i32) {
    %c0_i32 = arith.constant 0 : i32
    %c0_i32_0 = arith.constant 0 : i32
    %c0_i32_1 = arith.constant 0 : i32
    return %arg0, %c0_i32, %c0_i32_0 : i32, i32, i32
  }
}

</mosaic_0001>

<bundles_post_ra>
// kernel: tpu_custom_call.1
= control target key start
LH: loop header
LB: loop body
LE: loop exit
PB: predicated region body
PF: predicated region fallthrough
CT: control target
= control target key end

     0   :  { %s2067_s0 = inlined_call_operand.hbm [shape: f32[8,512], index: 0, kind: input, shape index: {}]   ;;  %s2068_s1 = inlined_call_operand.hbm [shape: bf16[2,256,512], index: 1, kind: input, shape index: {}]   ;;  %s2069_s2 = inlined_call_operand.hbm [shape: f32[2,1,512], index: 2, kind: input, shape index: {}]   ;;  %s2070_s3 = inlined_call_operand.hbm [shape: f32[2,8,128], index: 3, kind: output, shape index: {0}]   ;;  %s2071_s4 = inlined_call_operand.hbm [shape: f32[2,8,128], index: 4, kind: output, shape index: {1}]  }
   0x1   :  { %2072 = sst [smem:[#allocation16_spill]] %s2067_s0 }
   0x2   :  { %2073 = sst [smem:[#allocation17_spill]] %s2068_s1 }
   0x3   :  { %10 = vsyncpa [#allocation4], 0 }
   0x4   :  { %11 = vsyncpa [#allocation7], 0 }
   0x5   :  { %13 = vsyncpa [#allocation7 + $0x1], 0 }
   0x6   :  { %14 = vsyncpa [#allocation5], 0 }
   0x7   :  { %16 = vsyncpa [#allocation5 + $0x1], 0 }
   0x8   :  { %17 = vsyncpa [#allocation11], 0 }
   0x9   :  { %19 = vsyncpa [#allocation11 + $0x1], 0  ;;  %s1699_s15 = smov 0   ;;  %s1701_s16 = smov 0  }
   0xa   :  { %s1703_s17 = smov 0   ;;  %s1705_s18 = smov 0  }
   0xb LB: > { %s1720_s19 = sadd.s32 1, %s1668_s18   ;;  %s53_s20 = sadd.s32 1, %s1664_s17  ;;  %s1668_s18 = sphi %s1705_s18, %s2090_s18   ;;  %s1664_s17 = sphi %s1703_s17, %s2089_s17   ;;  %s1660_s16 = sphi %s1701_s16, %s2088_s16   ;;  %s1656_s15 = sphi %s1699_s15, %s2087_s15  }
   0xc   : > { %s50_s21 = ssub.s32 %s1668_s18, %s1720_s19  ;;  %p60_p0 = scmp.ne.s32.totalorder %s1664_s17, %s1660_s16 }
   0xd   : > { %p51_p1 = scmp.eq.s32.totalorder %s50_s21, 0  ;;  %p61_p2 = scmp.eq.s32.totalorder %s1668_s18, 0 }
   0xe   : > { %p1421_p4 = scmp.lt.s32.totalorder %s1668_s18, 2  ;;  %s180_s23 = sand.u32 1, %s1668_s18  }
   0xf   : > { %s1731_s22 = scalar_select %p51_p1, %s1664_s17, %s53_s20  }
  0x10   : > { %p62_p5 = por %p61_p2, %p60_p0  ;;  %s182_s24 = sand.u32 1, %s1664_s17  }
  0x11   : > { %s1048_s25 = sshll.u32 %s182_s24, 9  ;;  %s1325_s26 = sshll.u32 %s1668_s18, 9 }
  0x12   : > { %s2074_s1 = sld [smem:[#allocation17_spill]]  ;;  %s184_s5 = scalar_lea.vmem [#allocation6], %s1048_s25 }
  0x13   : > { %s192_s6 = sshll.u32 %s184_s5, 4  ;;  %p1746_p6 = pnand %p1421_p4, %p62_p5  ;;  %s193_s6 = int_to_ptr.vmem [resolvable:$true] %s192_s6 }
  0x14   : > { %s1750_s8 = scalar_lea.sflag [#allocation7], %s180_s23 }
  0x15   : > { %p1480_p8 = pneg %p1746_p6 }
  0x18   : > { %s189_s29 = scalar_lea.hbm %s2074_s1, %s1325_s26  ;;  %s1483_s13 = scalar_lea.hbm %s2074_s1, 1024 }
  0x19   : > { %s190_s30 = sshll.u32 %s189_s29, 4  ;;  %s191_s30 = int_to_ptr.hbm [resolvable:$true] %s190_s30 }
  0x1a   : > { %s1476_s9 = sshra.s32 %s191_s30, 4  ;;  %s1477_s9 = int_to_ptr.hbm [resolvable:$true] %s1476_s9 }
  0x1b   : > { %s1478_s10 = scalar_lea.hbm %s1477_s9, 512  ;;  %p1484_p11 = scmp.lt.s32.totalorder %s1477_s9, %s2074_s1 }
  0x1c   : > { %p1479_p7 = scmp.ne.s32.totalorder %s1477_s9, %s1478_s10  ;;  %p1485_p12 = scmp.lt.s32.totalorder %s1483_s13, %s1478_s10 }
  0x1e   : > { %p1481_p9 = pnand %p1480_p8, %p1479_p7  ;;  %p1486_p13 = por %p1485_p12, %p1484_p11 }
  0x20   : > { %p1482_p10 = pneg %p1481_p9 }
  0x22   : > { %p1487_p1 = pnand %p1486_p13, %p1482_p10 }
  0x24   : > { %1490 = shalt.err (!%p1487_p1)
}
  0x25   : > { %s1670_s21 = smov 256   ;;  %s1671_s23 = smov 16  }
  0x26   : > { %1409 = dma.hbm_to_vmem [thread:$0]  (!%p1746_p6), %s191_s30, 8192, %s193_s6, %s1750_s8, %s1670_s21, %s1670_s21, %s1671_s23  }
  0x27   : > { %s1767_s25 = sadd.s32 4294967295, %s1668_s18   ;;  %s1044_s26 = sadd.s32 4294967294, %s1668_s18  }
  0x28   : > { %p66_p2 = scmp.ne.s32.totalorder %s1660_s16, %s1656_s15  ;;  %p67_p4 = scmp.eq.s32.totalorder %s1767_s25, 0 }
  0x29   : > { %p116_p5 = scmp.eq.s32.totalorder %s1767_s25, 1  ;;  %p122_p7 = scmp.eq.s32.totalorder %s1044_s26, 1 }
  0x2a   : > { %p1776_p9 = por %p67_p4, %p66_p2  ;;  %p1045_p10 = scmp.ge.s32.totalorder %s1668_s18, 1 }
  0x2b   : > { %p1784_p11 = por %p116_p5, %p60_p0  ;;  %p1788_p12 = por %p122_p7, %p66_p2 }
  0x2c   : > { %p155_p13 = scmp.lt.s32.totalorder %s1668_s18, 3  ;;  %s2079_s0 = sld [smem:[#allocation16_spill]] }
  0x2d   : > { %s1672_s10 = smov [#allocation3]   ;;  %s1051_s12 = sshll.u32 %s182_s24, 2 }
  0x2e   : > { %p1797_p3 = pnand %p1045_p10, %p155_p13  ;;  %s169_s11 = sshll.u32 %s1672_s10, 4  ;;  %s170_s11 = int_to_ptr.vmem [resolvable:$true] %s169_s11 }
  0x2f   : > { %s1052_s13 = sshll.u32 %s1668_s18, 2  ;;  %s206_s26 = scalar_lea.vmem [#allocation8], %s1051_s12 }
  0x30   : > { %p1402_p0 = pneg %p1797_p3  ;;  %s210_s21 = scalar_lea.hbm %s2069_s2, %s1052_s13 }
  0x31   : > { %s212_s23 = sshll.u32 %s210_s21, 4  ;;  %s214_s30 = sshll.u32 %s206_s26, 4  ;;  %s213_s23 = int_to_ptr.hbm [resolvable:$true] %s212_s23  ;;  %s215_s30 = int_to_ptr.vmem [resolvable:$true] %s214_s30 }
  0x32   : > { %s167_s6 = sshll.u32 %s2079_s0, 4  ;;  %p1403_p2 = pnand %p1402_p0, %p67_p4  ;;  %s168_s6 = int_to_ptr.hbm [resolvable:$true] %s167_s6 }
  0x33   : > { %s1536_s5 = sshra.s32 %s213_s23, 4  ;;  %s1543_s1 = scalar_lea.hbm %s2069_s2, 8  ;;  %s1537_s5 = int_to_ptr.hbm [resolvable:$true] %s1536_s5 }
  0x34   : > { %1405 = dma.hbm_to_vmem [thread:$0]  (!%p1403_p2), %s168_s6, 512, %s170_s11, [#allocation4]  }
  0x35   : > { %s1538_s24 = scalar_lea.hbm %s1537_s5, 4  ;;  %p1544_p13 = scmp.lt.s32.totalorder %s1537_s5, %s2069_s2 }
  0x36   : > { %p1539_p5 = scmp.ne.s32.totalorder %s1537_s5, %s1538_s24  ;;  %p1545_p0 = scmp.lt.s32.totalorder %s1543_s1, %s1538_s24 }
  0x38   : > { %p1541_p7 = pnand %p1539_p5, %p1480_p8  ;;  %p1546_p1 = por %p1545_p0, %p1544_p13 }
  0x3a   : > { %p1542_p10 = pneg %p1541_p7 }
  0x3c   : > { %p1547_p2 = pnand %p1546_p1, %p1542_p10 }
  0x3e   : > { %1550 = shalt.err (!%p1547_p2)
}
  0x3f   : > { %1412 = dma.hbm_to_vmem [thread:$0]  (!%p1746_p6), %s213_s23, 64, %s215_s30, %s1750_s8  }
  0x40   : > { %223 = sbr.rel (%p1797_p3) target bundleno = 323 (0x143), region = 32 }
  0x45   : > { %1639 = dma.done.wait (%p67_p4), [#allocation4], 512  }
  0x46   : > { %1641 = vsyncadd (%p67_p4), [#allocation4], 4294966784  ;;  %s230_s0 = sand.u32 1, %s1767_s25   ;;  %s1831_s1 = sand.u32 1, %s1660_s16  }
  0x47   : > { %s1055_s6 = sshll.u32 %s1831_s1, 9  ;;  %s231_s7 = scalar_lea.sflag [#allocation7], %s230_s0 }
  0x48   : > { %s1834_s11 = scalar_lea.vmem [#allocation6], %s1055_s6 }
  0x49   : > { %1643 = dma.done.wait (%p1776_p9), %s231_s7, 8256  }
  0x4a   : > { %1645 = vsyncadd (%p1776_p9), %s231_s7, 4294959040  ;;  %s1056_s8 = sshll.u32 %s1831_s1, 2  ;;  %s1057_s9 = sshll.u32 %s1831_s1, 3 }
  0x4b   : > { %s1842_s12 = scalar_lea.vmem [#allocation8], %s1056_s8  ;;  %s1844_s20 = scalar_lea.vmem [#allocation9], %s1057_s9 }
  0x4c   : > { %s1846_s21 = scalar_lea.vmem [#allocation10], %s1057_s9  ;;  %p2081_p3 = scmp.ne.s32.totalorder %s1767_s25, 0 }
  0x4e   : > { %284 = sbr.rel (%p2081_p3) target bundleno = 85 (0x55), region = 48 }
  0x53   : > { %v1673_v0 = vmov 0  }
  0x54   : > { %285 = vst [vmem:[#allocation2] sm:$0xff] %v1673_v0 }
  0x55 PF: > { %v1174_v1 = vld [vmem:[%s1834_s11 + $0xe0] sm:$0xf]  ;;  %v1356_v2 = vld [vmem:[%s1834_s11 + $0xec] sm:$0xf0]  ;;  %v1354_v3 = vld [vmem:[%s1834_s11 + $0xe4] sm:$0xf] }
  0x56   : > { %v1175_v4 = vor.u32 %v1356_v2, %v1174_v1  ;;  %v1176_v5 = vld [vmem:[%s1834_s11 + $0xf0] sm:$0xf0]  ;;  %v1386_v6 = vld [vmem:[%s1834_s11 + $0x1e4] sm:$0xf]  ;;  %v1302_v10 = vld [vmem:[%s1834_s11 + $0x1e0] sm:$0xf] }
  0x57   : > { %v1304_v7 = vld [vmem:[%s1834_s11 + $0x1f0] sm:$0xf0]  ;;  %v1179_v8 = vor.u32 %v1354_v3, %v1176_v5  ;;  %v1388_v11 = vld [vmem:[%s1834_s11 + $0x1ec] sm:$0xf0]  ;;  %v1158_v12 = vld [vmem:[%s1834_s11 + $0xc0] sm:$0xf] }
  0x58   : > { %v1307_v9 = vor.u32 %v1386_v6, %v1304_v7  ;;  %688 = vmatpush.bf16.msra.mxu0 %v1175_v4  ;;  %v1303_v13 = vor.u32 %v1388_v11, %v1302_v10  ;;  %v1352_v14 = vld [vmem:[%s1834_s11 + $0xcc] sm:$0xf0]  ;;  %v1350_v15 = vld [vmem:[%s1834_s11 + $0xc4] sm:$0xf]  ;;  %v1160_v16 = vld [vmem:[%s1834_s11 + $0xd0] sm:$0xf0] }
  0x59   : > { %714 = vmatpush.bf16.msra.mxu2 %v1179_v8  ;;  %v1159_v17 = vor.u32 %v1352_v14, %v1158_v12  ;;  %v1163_v18 = vor.u32 %v1350_v15, %v1160_v16  ;;  %v1382_v19 = vld [vmem:[%s1834_s11 + $0x1c4] sm:$0xf]  ;;  %v1288_v20 = vld [vmem:[%s1834_s11 + $0x1d0] sm:$0xf0]  ;;  %v1286_v21 = vld [vmem:[%s1834_s11 + $0x1c0] sm:$0xf] }
  0x5a   : > { %727 = vmatpush.bf16.msra.mxu3 %v1307_v9  ;;  %701 = vmatpush.bf16.msra.mxu1 %v1303_v13  ;;  %v1291_v22 = vor.u32 %v1382_v19, %v1288_v20  ;;  %v1384_v23 = vld [vmem:[%s1834_s11 + $0x1cc] sm:$0xf0]  ;;  %v1142_v24 = vld [vmem:[%s1834_s11 + $0xa0] sm:$0xf]  ;;  %v1346_v27 = vld [vmem:[%s1834_s11 + $0xa4] sm:$0xf] }
  0x5b   : > { %v1348_v25 = vld [vmem:[%s1834_s11 + $0xac] sm:$0xf0]  ;;  %v1287_v26 = vor.u32 %v1384_v23, %v1286_v21  ;;  %v1144_v28 = vld [vmem:[%s1834_s11 + $0xb0] sm:$0xf0]  ;;  %v1378_v29 = vld [vmem:[%s1834_s11 + $0x1a4] sm:$0xf] }
  0x5c   : > { %689 = vmatpush.bf16.msra.mxu0 %v1159_v17  ;;  %v1143_v30 = vor.u32 %v1348_v25, %v1142_v24  ;;  %v1272_v31 = vld [vmem:[%s1834_s11 + $0x1b0] sm:$0xf0]  ;;  %v1270_v32 = vld [vmem:[%s1834_s11 + $0x1a0] sm:$0xf]  ;;  %v1380_v33 = vld [vmem:[%s1834_s11 + $0x1ac] sm:$0xf0]  ;;  %v1147_v34 = vor.u32 %v1346_v27, %v1144_v28 }
  0x5d   : > { %715 = vmatpush.bf16.msra.mxu2 %v1163_v18  ;;  %v1275_v35 = vor.u32 %v1378_v29, %v1272_v31  ;;  %v1126_v36 = vld [vmem:[%s1834_s11 + $0x80] sm:$0xf]  ;;  %v1344_v37 = vld [vmem:[%s1834_s11 + $0x8c] sm:$0xf0]  ;;  %v1342_v38 = vld [vmem:[%s1834_s11 + $0x84] sm:$0xf]  ;;  %v1271_v39 = vor.u32 %v1380_v33, %v1270_v32 }
  0x5e   : > { %728 = vmatpush.bf16.msra.mxu3 %v1291_v22  ;;  %702 = vmatpush.bf16.msra.mxu1 %v1287_v26  ;;  %v1128_v40 = vld [vmem:[%s1834_s11 + $0x90] sm:$0xf0]  ;;  %v1374_v41 = vld [vmem:[%s1834_s11 + $0x184] sm:$0xf]  ;;  %v1254_v43 = vld [vmem:[%s1834_s11 + $0x180] sm:$0xf]  ;;  %v1127_v45 = vor.u32 %v1344_v37, %v1126_v36 }
  0x5f   : > { %v1256_v42 = vld [vmem:[%s1834_s11 + $0x190] sm:$0xf0]  ;;  %v1376_v44 = vld [vmem:[%s1834_s11 + $0x18c] sm:$0xf0]  ;;  %v1131_v46 = vor.u32 %v1342_v38, %v1128_v40  ;;  %v1110_v48 = vld [vmem:[%s1834_s11 + $0x60] sm:$0xf] }
  0x60   : > { %690 = vmatpush.bf16.msra.mxu0 %v1143_v30  ;;  %v1259_v47 = vor.u32 %v1374_v41, %v1256_v42  ;;  %v1340_v49 = vld [vmem:[%s1834_s11 + $0x6c] sm:$0xf0]  ;;  %v1338_v50 = vld [vmem:[%s1834_s11 + $0x64] sm:$0xf]  ;;  %v1255_v51 = vor.u32 %v1376_v44, %v1254_v43  ;;  %v1112_v52 = vld [vmem:[%s1834_s11 + $0x70] sm:$0xf0] }
  0x61   : > { %716 = vmatpush.bf16.msra.mxu2 %v1147_v34  ;;  %v1370_v53 = vld [vmem:[%s1834_s11 + $0x164] sm:$0xf]  ;;  %v1240_v54 = vld [vmem:[%s1834_s11 + $0x170] sm:$0xf0]  ;;  %v1238_v55 = vld [vmem:[%s1834_s11 + $0x160] sm:$0xf]  ;;  %v1111_v57 = vor.u32 %v1340_v49, %v1110_v48  ;;  %v1115_v58 = vor.u32 %v1338_v50, %v1112_v52 }
  0x62   : > { %729 = vmatpush.bf16.msra.mxu3 %v1275_v35  ;;  %703 = vmatpush.bf16.msra.mxu1 %v1271_v39  ;;  %v1372_v56 = vld [vmem:[%s1834_s11 + $0x16c] sm:$0xf0]  ;;  %v1243_v59 = vor.u32 %v1370_v53, %v1240_v54  ;;  %v1094_v60 = vld [vmem:[%s1834_s11 + $0x40] sm:$0xf]  ;;  %v1334_v62 = vld [vmem:[%s1834_s11 + $0x44] sm:$0xf] }
  0x63   : > { %v1336_v61 = vld [vmem:[%s1834_s11 + $0x4c] sm:$0xf0]  ;;  %v1239_v63 = vor.u32 %v1372_v56, %v1238_v55  ;;  %v1096_v0 = vld [vmem:[%s1834_s11 + $0x50] sm:$0xf0]  ;;  %v1366_v1 = vld [vmem:[%s1834_s11 + $0x144] sm:$0xf] }
  0x64   : > { %691 = vmatpush.bf16.msra.mxu0 %v1127_v45  ;;  %v1224_v2 = vld [vmem:[%s1834_s11 + $0x150] sm:$0xf0]  ;;  %v1222_v3 = vld [vmem:[%s1834_s11 + $0x140] sm:$0xf]  ;;  %v1368_v4 = vld [vmem:[%s1834_s11 + $0x14c] sm:$0xf0]  ;;  %v1095_v5 = vor.u32 %v1336_v61, %v1094_v60  ;;  %v1099_v6 = vor.u32 %v1334_v62, %v1096_v0 }
  0x65   : > { %717 = vmatpush.bf16.msra.mxu2 %v1131_v46  ;;  %v1227_v7 = vor.u32 %v1366_v1, %v1224_v2  ;;  %v1078_v8 = vld [vmem:[%s1834_s11 + $0x20] sm:$0xf]  ;;  %v1332_v9 = vld [vmem:[%s1834_s11 + $0x2c] sm:$0xf0]  ;;  %v1330_v10 = vld [vmem:[%s1834_s11 + $0x24] sm:$0xf]  ;;  %v1223_v11 = vor.u32 %v1368_v4, %v1222_v3 }
  0x66   : > { %730 = vmatpush.bf16.msra.mxu3 %v1259_v47  ;;  %704 = vmatpush.bf16.msra.mxu1 %v1255_v51  ;;  %v1080_v12 = vld [vmem:[%s1834_s11 + $0x30] sm:$0xf0]  ;;  %v1362_v13 = vld [vmem:[%s1834_s11 + $0x124] sm:$0xf]  ;;  %v1206_v15 = vld [vmem:[%s1834_s11 + $0x120] sm:$0xf]  ;;  %v1079_v17 = vor.u32 %v1332_v9, %v1078_v8 }
  0x67   : > { %v1208_v14 = vld [vmem:[%s1834_s11 + $0x130] sm:$0xf0]  ;;  %v1364_v16 = vld [vmem:[%s1834_s11 + $0x12c] sm:$0xf0]  ;;  %v1062_v18 = vld [vmem:[%s1834_s11] sm:$0xf]  ;;  %v1083_v21 = vor.u32 %v1330_v10, %v1080_v12 }
  0x68   : > { %692 = vmatpush.bf16.msra.mxu0 %v1111_v57  ;;  %v1328_v19 = vld [vmem:[%s1834_s11 + $0xc] sm:$0xf0]  ;;  %v1326_v20 = vld [vmem:[%s1834_s11 + $0x4] sm:$0xf]  ;;  %v1211_v22 = vor.u32 %v1362_v13, %v1208_v14  ;;  %v1064_v23 = vld [vmem:[%s1834_s11 + $0x10] sm:$0xf0]  ;;  %v1207_v26 = vor.u32 %v1364_v16, %v1206_v15 }
  0x69   : > { %718 = vmatpush.bf16.msra.mxu2 %v1115_v58  ;;  %v1358_v24 = vld [vmem:[%s1834_s11 + $0x104] sm:$0xf]  ;;  %v286_v25 = vld [vmem:[#allocation2] sm:$0xff]  ;;  %v1192_v27 = vld [vmem:[%s1834_s11 + $0x110] sm:$0xf0]  ;;  %v1063_v33 = vor.u32 %v1328_v19, %v1062_v18  ;;  %v1067_v38 = vor.u32 %v1326_v20, %v1064_v23  ;;  %s1321_s26 = sshll.u32 %s1767_s25, 3 }
  0x6a   : > { %731 = vmatpush.bf16.msra.mxu3 %v1243_v59  ;;  %705 = vmatpush.bf16.msra.mxu1 %v1239_v63  ;;  %v1182_v28 = vld [vmem:[%s1834_s11 + $0xe8] sm:$0xf]  ;;  %v1357_v29 = vld [vmem:[%s1834_s11 + $0xf4] sm:$0xf0]  ;;  %v1355_v30 = vld [vmem:[%s1834_s11 + $0xec] sm:$0xf]  ;;  %v362_v37 = vunpack.c.l.b16 %v286_v25  ;;  %v1195_v39 = vor.u32 %v1358_v24, %v1192_v27  ;;  %v363_v42 = vunpack.c.h.b16 %v286_v25  ;;  %s904_s24 = scalar_lea.hbm %s2071_s4, %s1321_s26 }
  0x6b   : > { %v1184_v31 = vld [vmem:[%s1834_s11 + $0xf8] sm:$0xf0]  ;;  %v1387_v32 = vld [vmem:[%s1834_s11 + $0x1ec] sm:$0xf]  ;;  %v1190_v35 = vld [vmem:[%s1834_s11 + $0x100] sm:$0xf]  ;;  %v1183_v43 = vor.u32 %v1357_v29, %v1182_v28 }
  0x6c   : > { %693 = vmatpush.bf16.msra.mxu0 %v1095_v5  ;;  %v1312_v34 = vld [vmem:[%s1834_s11 + $0x1f8] sm:$0xf0]  ;;  %v1360_v36 = vld [vmem:[%s1834_s11 + $0x10c] sm:$0xf0]  ;;  %v1310_v40 = vld [vmem:[%s1834_s11 + $0x1e8] sm:$0xf]  ;;  %v1187_v44 = vor.u32 %v1355_v30, %v1184_v31  ;;  %v1926_v51 = vpack.c.b16 %v362_v37, %v362_v37  ;;  %v1930_v55 = vpack.c.b16 %v363_v42, %v363_v42 }
  0x6d   : > { %719 = vmatpush.bf16.msra.mxu2 %v1099_v6  ;;  %v1389_v41 = vld [vmem:[%s1834_s11 + $0x1f4] sm:$0xf0]  ;;  %v1166_v45 = vld [vmem:[%s1834_s11 + $0xc8] sm:$0xf]  ;;  %v1315_v46 = vor.u32 %v1387_v32, %v1312_v34  ;;  %v1191_v47 = vor.u32 %v1360_v36, %v1190_v35  ;;  %v1351_v49 = vld [vmem:[%s1834_s11 + $0xcc] sm:$0xf] }
  0x6e   : > { %732 = vmatpush.bf16.msra.mxu3 %v1227_v7  ;;  %706 = vmatpush.bf16.msra.mxu1 %v1223_v11  ;;  %v1353_v48 = vld [vmem:[%s1834_s11 + $0xd4] sm:$0xf0]  ;;  %v1168_v50 = vld [vmem:[%s1834_s11 + $0xd8] sm:$0xf0]  ;;  %v1311_v52 = vor.u32 %v1389_v41, %v1310_v40  ;;  %v1383_v53 = vld [vmem:[%s1834_s11 + $0x1cc] sm:$0xf] }
  0x6f   : > { %v1296_v54 = vld [vmem:[%s1834_s11 + $0x1d8] sm:$0xf0]  ;;  %v1294_v56 = vld [vmem:[%s1834_s11 + $0x1c8] sm:$0xf]  ;;  %v1385_v57 = vld [vmem:[%s1834_s11 + $0x1d4] sm:$0xf0]  ;;  %v1167_v58 = vor.u32 %v1353_v48, %v1166_v45  ;;  %v1171_v59 = vor.u32 %v1351_v49, %v1168_v50 }
  0x70   : > { %694 = vmatpush.bf16.msra.mxu0 %v1079_v17  ;;  %v1150_v60 = vld [vmem:[%s1834_s11 + $0xa8] sm:$0xf]  ;;  %v1299_v61 = vor.u32 %v1383_v53, %v1296_v54  ;;  %v1349_v62 = vld [vmem:[%s1834_s11 + $0xb4] sm:$0xf0]  ;;  %v1347_v63 = vld [vmem:[%s1834_s11 + $0xac] sm:$0xf]  ;;  %v1295_v1 = vor.u32 %v1385_v57, %v1294_v56 }
  0x71   : > { %720 = vmatpush.bf16.msra.mxu2 %v1083_v21  ;;  %v1152_v0 = vld [vmem:[%s1834_s11 + $0xb8] sm:$0xf0]  ;;  %v1379_v2 = vld [vmem:[%s1834_s11 + $0x1ac] sm:$0xf]  ;;  %v1278_v4 = vld [vmem:[%s1834_s11 + $0x1a8] sm:$0xf]  ;;  %v1151_v6 = vor.u32 %v1349_v62, %v1150_v60 }
  0x72   : > { %733 = vmatpush.bf16.msra.mxu3 %v1211_v22  ;;  %707 = vmatpush.bf16.msra.mxu1 %v1207_v26  ;;  %v1280_v3 = vld [vmem:[%s1834_s11 + $0x1b8] sm:$0xf0]  ;;  %v1381_v5 = vld [vmem:[%s1834_s11 + $0x1b4] sm:$0xf0]  ;;  %v1155_v7 = vor.u32 %v1347_v63, %v1152_v0  ;;  %v1134_v8 = vld [vmem:[%s1834_s11 + $0x88] sm:$0xf] }
  0x73   : > { %v1283_v9 = vor.u32 %v1379_v2, %v1280_v3  ;;  %v1345_v10 = vld [vmem:[%s1834_s11 + $0x94] sm:$0xf0]  ;;  %v1343_v11 = vld [vmem:[%s1834_s11 + $0x8c] sm:$0xf]  ;;  %v1136_v12 = vld [vmem:[%s1834_s11 + $0x98] sm:$0xf0]  ;;  %v1279_v13 = vor.u32 %v1381_v5, %v1278_v4 }
  0x74   : > { %695 = vmatpush.bf16.msra.mxu0 %v1063_v33  ;;  %v1375_v14 = vld [vmem:[%s1834_s11 + $0x18c] sm:$0xf]  ;;  %v1264_v15 = vld [vmem:[%s1834_s11 + $0x198] sm:$0xf0]  ;;  %v1262_v16 = vld [vmem:[%s1834_s11 + $0x188] sm:$0xf]  ;;  %v1135_v18 = vor.u32 %v1345_v10, %v1134_v8  ;;  %v1139_v19 = vor.u32 %v1343_v11, %v1136_v12 }
  0x75   : > { %721 = vmatpush.bf16.msra.mxu2 %v1067_v38  ;;  %v1377_v17 = vld [vmem:[%s1834_s11 + $0x194] sm:$0xf0]  ;;  %v1118_v20 = vld [vmem:[%s1834_s11 + $0x68] sm:$0xf]  ;;  %v1267_v21 = vor.u32 %v1375_v14, %v1264_v15  ;;  %v1339_v23 = vld [vmem:[%s1834_s11 + $0x6c] sm:$0xf] }
  0x76   : > { %734 = vmatpush.bf16.msra.mxu3 %v1195_v39  ;;  %708 = vmatpush.bf16.msra.mxu1 %v1191_v47  ;;  %v1341_v22 = vld [vmem:[%s1834_s11 + $0x74] sm:$0xf0]  ;;  %v1120_v24 = vld [vmem:[%s1834_s11 + $0x78] sm:$0xf0]  ;;  %v1263_v25 = vor.u32 %v1377_v17, %v1262_v16  ;;  %v1371_v26 = vld [vmem:[%s1834_s11 + $0x16c] sm:$0xf] }
  0x77   : > { %696 = vmatmul.bf16.vlgmr.msra.gmra.mxu0 %v1926_v51  ;;  %v1248_v27 = vld [vmem:[%s1834_s11 + $0x178] sm:$0xf0]  ;;  %v1246_v28 = vld [vmem:[%s1834_s11 + $0x168] sm:$0xf]  ;;  %v1373_v29 = vld [vmem:[%s1834_s11 + $0x174] sm:$0xf0]  ;;  %v1119_v30 = vor.u32 %v1341_v22, %v1118_v20  ;;  %v1123_v31 = vor.u32 %v1339_v23, %v1120_v24 }
  0x78   : > { %740 = vmatpush.bf16.msrb.mxu0 %v1183_v43  ;;  %722 = vmatmul.bf16.vlgmr.msra.gmra.mxu2 %v1926_v51  ;;  %v1102_v32 = vld [vmem:[%s1834_s11 + $0x48] sm:$0xf]  ;;  %v1251_v33 = vor.u32 %v1371_v26, %v1248_v27  ;;  %v1337_v34 = vld [vmem:[%s1834_s11 + $0x54] sm:$0xf0]  ;;  %v1335_v35 = vld [vmem:[%s1834_s11 + $0x4c] sm:$0xf]  ;;  %v1247_v37 = vor.u32 %v1373_v29, %v1246_v28 }
  0x79   : > { %766 = vmatpush.bf16.msrb.mxu2 %v1187_v44  ;;  %735 = vmatmul.bf16.vlgmr.msra.gmra.mxu3 %v1930_v55  ;;  %v1104_v36 = vld [vmem:[%s1834_s11 + $0x58] sm:$0xf0]  ;;  %v1367_v38 = vld [vmem:[%s1834_s11 + $0x14c] sm:$0xf]  ;;  %v1230_v40 = vld [vmem:[%s1834_s11 + $0x148] sm:$0xf]  ;;  %v1103_v42 = vor.u32 %v1337_v34, %v1102_v32 }
  0x7a   : > { %779 = vmatpush.bf16.msrb.mxu3 %v1315_v46  ;;  %753 = vmatpush.bf16.msrb.mxu1 %v1311_v52  ;;  %v1232_v39 = vld [vmem:[%s1834_s11 + $0x158] sm:$0xf0]  ;;  %v1369_v41 = vld [vmem:[%s1834_s11 + $0x154] sm:$0xf0]  ;;  %v1107_v43 = vor.u32 %v1335_v35, %v1104_v36  ;;  %v1086_v44 = vld [vmem:[%s1834_s11 + $0x28] sm:$0xf] }
  0x7b   : > { %709 = vmatmul.bf16.vlgmr.msra.gmra.mxu1 %v1930_v55  ;;  %v1235_v45 = vor.u32 %v1367_v38, %v1232_v39  ;;  %v1333_v46 = vld [vmem:[%s1834_s11 + $0x34] sm:$0xf0]  ;;  %v1331_v47 = vld [vmem:[%s1834_s11 + $0x2c] sm:$0xf]  ;;  %v1088_v48 = vld [vmem:[%s1834_s11 + $0x38] sm:$0xf0]  ;;  %v1231_v49 = vor.u32 %v1369_v41, %v1230_v40 }
  0x7c   : > { %741 = vmatpush.bf16.msrb.mxu0 %v1167_v58  ;;  %v1363_v50 = vld [vmem:[%s1834_s11 + $0x12c] sm:$0xf]  ;;  %v1216_v52 = vld [vmem:[%s1834_s11 + $0x138] sm:$0xf0]  ;;  %v1214_v53 = vld [vmem:[%s1834_s11 + $0x128] sm:$0xf]  ;;  %v1087_v56 = vor.u32 %v1333_v46, %v1086_v44  ;;  %v1091_v57 = vor.u32 %v1331_v47, %v1088_v48 }
  0x7d   : > { %767 = vmatpush.bf16.msrb.mxu2 %v1171_v59  ;;  %v1365_v54 = vld [vmem:[%s1834_s11 + $0x134] sm:$0xf0]  ;;  %v1070_v58 = vld [vmem:[%s1834_s11 + $0x8] sm:$0xf]  ;;  %v1219_v59 = vor.u32 %v1363_v50, %v1216_v52  ;;  %v1072_v62 = vld [vmem:[%s1834_s11 + $0x18] sm:$0xf0] }
  0x7e   : > { %780 = vmatpush.bf16.msrb.mxu3 %v1299_v61  ;;  %754 = vmatpush.bf16.msrb.mxu1 %v1295_v1  ;;  %v1329_v60 = vld [vmem:[%s1834_s11 + $0x14] sm:$0xf0]  ;;  %v1327_v61 = vld [vmem:[%s1834_s11 + $0xc] sm:$0xf]  ;;  %v1215_v63 = vor.u32 %v1365_v54, %v1214_v53  ;;  %v1200_v1 = vld [vmem:[%s1834_s11 + $0x118] sm:$0xf0] }
  0x7f   : > { %v1359_v0 = vld [vmem:[%s1834_s11 + $0x10c] sm:$0xf]  ;;  %v1198_v2 = vld [vmem:[%s1834_s11 + $0x108] sm:$0xf]  ;;  %v1361_v3 = vld [vmem:[%s1834_s11 + $0x114] sm:$0xf0]  ;;  %v1071_v4 = vor.u32 %v1329_v60, %v1070_v58  ;;  %v1075_v5 = vor.u32 %v1327_v61, %v1072_v62 }
  0x80   : > { %742 = vmatpush.bf16.msrb.mxu0 %v1151_v6  ;;  %v1203_v6 = vor.u32 %v1359_v0, %v1200_v1  ;;  %s792_s27 = scalar_select %p67_p4, 1, 0  ;;  %v1993_v8 = vld [vmem:[%s1842_s12] sm:$0xf]  ;;  %v797_v52 = vld [vmem:[#allocation3 + $0x18] sm:$0xff] }
  0x81   : > { %768 = vmatpush.bf16.msrb.mxu2 %v1155_v7  ;;  %v1199_v7 = vor.u32 %v1361_v3, %v1198_v2  ;;  %v794_v10 = vld [vmem:[#allocation3] sm:$0xff]  ;;  %v354_v15 = vperm.slane %v1993_v8, 1  ;;  %v355_v36 = vperm.slane %v1993_v8, 2  ;;  %v356_v44 = vperm.slane %v1993_v8, 3  ;;  %s906_s10 = sshll.u32 %s1846_s21, 4  ;;  %s908_s14 = sshll.u32 %s904_s24, 4  ;;  %s907_s10 = int_to_ptr.vmem [resolvable:$true] %s906_s10  ;;  %s909_s14 = int_to_ptr.hbm [resolvable:$true] %s908_s14 }
  0x82   : > { %781 = vmatpush.bf16.msrb.mxu3 %v1283_v9  ;;  %755 = vmatpush.bf16.msrb.mxu1 %v1279_v13  ;;  %s793_s23 = scvt.s32.f32 %s792_s27  ;;  %v353_v9 = vperm.slane %v1993_v8, 0  ;;  %s880_s13 = scalar_lea.sflag [#allocation11], %s1831_s1 }
  0x83   : > { %s1580_s0 = sshra.s32 %s909_s14, 4  ;;  %s1586_s8 = scalar_lea.hbm %s2071_s4, 16  ;;  %s1581_s0 = int_to_ptr.hbm [resolvable:$true] %s1580_s0 }
  0x84   : > { %743 = vmatpush.bf16.msrb.mxu0 %v1135_v18  ;;  %v798_v12 = vstv %s793_s23  ;;  %s1582_s6 = scalar_lea.hbm %s1581_s0, 8  ;;  %p1587_p9 = scmp.lt.s32.totalorder %s1581_s0, %s2071_s4 }
  0x85   : > { %769 = vmatpush.bf16.msrb.mxu2 %v1139_v19  ;;  %v799_v14 = vmul.f32 %v798_v12, %v794_v10  ;;  %v802_v61 = vmul.f32 %v798_v12, %v797_v52  ;;  %p1583_p6 = scmp.ne.s32.totalorder %s1581_s0, %s1582_s6  ;;  %p1588_p1 = scmp.lt.s32.totalorder %s1586_s8, %s1582_s6 }
  0x86   : > { %782 = vmatpush.bf16.msrb.mxu3 %v1267_v21  ;;  %756 = vmatpush.bf16.msrb.mxu1 %v1263_v25 }
  0x87   : > { %p1584_p8 = pnand %p1583_p6, %p1784_p11  ;;  %p1589_p5 = por %p1588_p1, %p1587_p9 }
  0x88   : > { %744 = vmatpush.bf16.msrb.mxu0 %v1119_v30 }
  0x89   : > { %770 = vmatpush.bf16.msrb.mxu2 %v1123_v31  ;;  %p1585_p4 = pneg %p1584_p8 }
  0x8a   : > { %783 = vmatpush.bf16.msrb.mxu3 %v1251_v33  ;;  %757 = vmatpush.bf16.msrb.mxu1 %v1247_v37  ;;  %v796_v37 = vld [vmem:[#allocation3 + $0x10] sm:$0xff] }
  0x8b   : > { %p1590_p7 = pnand %p1589_p5, %p1585_p4 }
  0x8c   : > { %745 = vmatpush.bf16.msrb.mxu0 %v1103_v42  ;;  %v801_v42 = vmul.f32 %v798_v12, %v796_v37 }
  0x8d   : > { %771 = vmatpush.bf16.msrb.mxu2 %v1107_v43 }
  0x8e   : > { %784 = vmatpush.bf16.msrb.mxu3 %v1235_v45  ;;  %758 = vmatpush.bf16.msrb.mxu1 %v1231_v49 }
  0x90   : > { %746 = vmatpush.bf16.msrb.mxu0 %v1087_v56 }
  0x91   : > { %772 = vmatpush.bf16.msrb.mxu2 %v1091_v57 }
  0x92   : > { %785 = vmatpush.bf16.msrb.mxu3 %v1219_v59  ;;  %759 = vmatpush.bf16.msrb.mxu1 %v1215_v63 }
  0x94   : > { %747 = vmatpush.bf16.msrb.mxu0 %v1071_v4 }
  0x95   : > { %773 = vmatpush.bf16.msrb.mxu2 %v1075_v5 }
  0x96   : > { %786 = vmatpush.bf16.msrb.mxu3 %v1203_v6  ;;  %760 = vmatpush.bf16.msrb.mxu1 %v1199_v7 }
  0x97   : > { %748 = vmatmul.bf16.vlgmr.msrb.gmra.mxu0 %v1926_v51 }
  0x98   : > { %774 = vmatmul.bf16.vlgmr.msrb.gmra.mxu2 %v1926_v51  ;;  %v795_v51 = vld [vmem:[#allocation3 + $0x8] sm:$0xff] }
  0x99   : > { %787 = vmatmul.bf16.vlgmr.msrb.gmra.mxu3 %v1930_v55  ;;  %761 = vmatmul.bf16.vlgmr.msrb.gmra.mxu1 %v1930_v55  ;;  %v800_v21 = vmul.f32 %v798_v12, %v795_v51 }
  0xf4   : > { %v697_v11 = vpop.f32.mrf.mxu0 }
  0xf5   : > { %v698_v13 = vadd.f32 %v697_v11, %v353_v9 }
  0xf8   : > { %v710_v16 = vpop.f32.mrf.mxu1 }
  0xf9   : > { %v711_v17 = vadd.f32 %v710_v16, %v698_v13 }
  0xfb   : > { %v723_v18 = vpop.f32.mrf.mxu2  ;;  %v803_v19 = vadd.f32 %v799_v14, %v711_v17 }
  0xfc   : > { %v724_v55 = vadd.f32 %v723_v18, %v354_v15  ;;  %v736_v20 = vpop.f32.mrf.mxu3  ;;  %v699_v24 = vpop.f32.mrf.mxu0 }
  0xfd   : > { %v1316_v22 = vmul.f32 -1.442695, %v803_v19 }
  0xfe   : > { %v737_v23 = vadd.f32 %v736_v20, %v724_v55 }
  0xff   : > { %1460 = vpow2.f32 %v1316_v22 }
 0x100   : > { %v804_v25 = vadd.f32 %v800_v21, %v737_v23  ;;  %v712_v26 = vpop.f32.mrf.mxu1 }
 0x102   : > { %v1317_v27 = vmul.f32 -1.442695, %v804_v25 }
 0x103   : > { %v725_v28 = vpop.f32.mrf.mxu2 }
 0x104   : > { %1462 = vpow2.f32 %v1317_v27  ;;  %v738_v29 = vpop.f32.mrf.mxu3 }
 0x105   : > { %v1461_v30 = vpop.eup %1460 }
 0x106   : > { %v810_v31 = vadd.f32 1.0, %v1461_v30 }
 0x108   : > { %1464 = vrcp.f32 %v810_v31  ;;  %vm816_vm0 = vweird.f32 %v810_v31  ;;  %v820_v47 = vand.u32 2147483647, %v810_v31  ;;  %v822_v50 = vand.u32 2147483648, %v810_v31 }
 0x10a   : > { %v1463_v32 = vpop.eup %1462  ;;  %v823_v63 = vor.u32 1.1754944e-38, %v822_v50  ;;  %vm821_vm6 = vcmp.eq.f32.partialorder %v820_v47, 8.507059e+37 }
 0x10b   : > { %v829_v33 = vadd.f32 1.0, %v1463_v32 }
 0x10d   : > { %1466 = vrcp.f32 %v829_v33  ;;  %vm835_vm2 = vweird.f32 %v829_v33  ;;  %v841_v48 = vand.u32 2147483648, %v829_v33  ;;  %v839_v56 = vand.u32 2147483647, %v829_v33 }
 0x10e   : > { %v1465_v34 = vpop.eup %1464 }
 0x10f   : > { %v812_v35 = vmul.f32 %v1465_v34, %v810_v31  ;;  %vm817_vm1 = vweird.f32 %v1465_v34  ;;  %v842_v62 = vor.u32 1.1754944e-38, %v841_v48  ;;  %vm840_vm7 = vcmp.eq.f32.partialorder %v839_v56, 8.507059e+37 }
 0x110   : > { %vm1999_vm4 = vmor %vm816_vm0, %vm817_vm1 }
 0x111   : > { %v813_v38 = vsub.f32 1.0, %v812_v35 }
 0x113   : > { %v1467_v40 = vpop.eup %1466  ;;  %v814_v43 = vmul.f32 %v1465_v34, %v813_v38 }
 0x114   : > { %v749_v39 = vpop.f32.mrf.mxu0  ;;  %v831_v45 = vmul.f32 %v1467_v40, %v829_v33  ;;  %vm836_vm3 = vweird.f32 %v1467_v40 }
 0x115   : > { %v750_v41 = vadd.f32 %v749_v39, %v355_v36  ;;  %v815_v54 = vadd.f32 %v1465_v34, %v814_v43  ;;  %vm2004_vm5 = vmor %vm835_vm2, %vm836_vm3 }
 0x116   : > { %v762_v46 = vpop.f32.mrf.mxu1  ;;  %v832_v53 = vsub.f32 1.0, %v831_v45 }
 0x117   : > { %v763_v49 = vadd.f32 %v762_v46, %v750_v41  ;;  %v819_v3 = vsel %vm1999_vm4, %v1465_v34, %v815_v54 }
 0x118   : > { %v833_v59 = vmul.f32 %v1467_v40, %v832_v53  ;;  %v824_v9 = vsel %vm821_vm6, %v823_v63, %v819_v3 }
 0x119   : > { %v805_v57 = vadd.f32 %v801_v42, %v763_v49 }
 0x11a   : > { %v834_v4 = vadd.f32 %v1467_v40, %v833_v59 }
 0x11b   : > { %v775_v60 = vpop.f32.mrf.mxu2  ;;  %1468 = vtanh.f32 %v805_v57 }
 0x11c   : > { %v776_v1 = vadd.f32 %v775_v60, %v356_v44  ;;  %v788_v2 = vpop.f32.mrf.mxu3  ;;  %v751_v5 = vpop.f32.mrf.mxu0  ;;  %v838_v7 = vsel %vm2004_vm5, %v1467_v40, %v834_v4 }
 0x11d   : > { %v843_v10 = vsel %vm840_vm7, %v842_v62, %v838_v7 }
 0x11e   : > { %v789_v6 = vadd.f32 %v788_v2, %v776_v1  ;;  %v764_v8 = vpop.f32.mrf.mxu1  ;;  %v865_v14 = vmul.f32 0.0, %v843_v10 }
 0x120   : > { %v806_v11 = vadd.f32 %v802_v61, %v789_v6 }
 0x121   : > { %v1469_v12 = vpop.eup %1468 }
 0x122   : > { %v1318_v13 = vmul.f32 -1.442695, %v806_v11  ;;  %v866_v15 = vmul.f32 %v1469_v12, %v824_v9 }
 0x123   : > { %v777_v16 = vpop.f32.mrf.mxu2 }
 0x124   : > { %1470 = vpow2.f32 %v1318_v13  ;;  %v790_v51 = vpop.f32.mrf.mxu3  ;;  %v867_v17 = vadd.f32 %v866_v15, %v865_v14 }
 0x126   : > { %871 = vst [vmem:[%s1846_s21] sm:$0xff] %v867_v17 }
 0x127   : > { %1593 = shalt.err (!%p1590_p7)
}
 0x128   : > { %1399 = dma.vmem_to_hbm [thread:$0]  (%p1784_p11), %s907_s10, 128, %s909_s14, %s880_s13  }
 0x129   : > { %s890_s23 = scalar_lea.hbm %s2070_s3, %s1321_s26  ;;  %s892_s30 = sshll.u32 %s1844_s20, 4  ;;  %s893_s30 = int_to_ptr.vmem [resolvable:$true] %s892_s30 }
 0x12a   : > { %v1471_v18 = vpop.eup %1470  ;;  %s894_s5 = sshll.u32 %s890_s23, 4  ;;  %s875_s25 = scalar_lea.sflag [#allocation5], %s1831_s1  ;;  %s895_s5 = int_to_ptr.hbm [resolvable:$true] %s894_s5 }
 0x12b   : > { %v849_v19 = vadd.f32 1.0, %v1471_v18  ;;  %s1608_s24 = sshra.s32 %s895_s5, 4  ;;  %s1614_s13 = scalar_lea.hbm %s2070_s3, 16  ;;  %s1609_s24 = int_to_ptr.hbm [resolvable:$true] %s1608_s24 }
 0x12c   : > { %s1610_s26 = scalar_lea.hbm %s1609_s24, 8  ;;  %p1615_p2 = scmp.lt.s32.totalorder %s1609_s24, %s2070_s3 }
 0x12d   : > { %1472 = vrcp.f32 %v849_v19  ;;  %v861_v22 = vand.u32 2147483648, %v849_v19  ;;  %v859_v24 = vand.u32 2147483647, %v849_v19  ;;  %vm855_vm9 = vweird.f32 %v849_v19  ;;  %p1611_p10 = scmp.ne.s32.totalorder %s1609_s24, %s1610_s26  ;;  %p1616_p3 = scmp.lt.s32.totalorder %s1614_s13, %s1610_s26 }
 0x12e   : > { %1474 = vtanh.f32 %v867_v17 }
 0x12f   : > { %v862_v26 = vor.u32 1.1754944e-38, %v861_v22  ;;  %vm860_vm11 = vcmp.eq.f32.partialorder %v859_v24, 8.507059e+37  ;;  %p1612_p13 = pnand %p1611_p10, %p1784_p11  ;;  %p1617_p6 = por %p1616_p3, %p1615_p2 }
 0x131   : > { %p1613_p0 = pneg %p1612_p13 }
 0x133   : > { %v1473_v55 = vpop.eup %1472  ;;  %p1618_p8 = pnand %p1617_p6, %p1613_p0 }
 0x134   : > { %v851_v20 = vmul.f32 %v1473_v55, %v849_v19  ;;  %vm856_vm8 = vweird.f32 %v1473_v55  ;;  %v1475_v28 = vpop.eup %1474 }
 0x135   : > { %vm857_vm10 = vmor %vm855_vm9, %vm856_vm8 }
 0x136   : > { %v852_v21 = vsub.f32 1.0, %v851_v20 }
 0x138   : > { %v853_v23 = vmul.f32 %v1473_v55, %v852_v21 }
 0x13a   : > { %v854_v25 = vadd.f32 %v1473_v55, %v853_v23 }
 0x13c   : > { %v858_v27 = vsel %vm857_vm10, %v1473_v55, %v854_v25 }
 0x13d   : > { %v863_v29 = vsel %vm860_vm11, %v862_v26, %v858_v27 }
 0x13e   : > { %v869_v30 = vmul.f32 %v1475_v28, %v863_v29 }
 0x140   : > { %870 = vst [vmem:[%s1844_s20] sm:$0xff] %v869_v30  ;;  %v872_v31 = vpack.c.bf16 %v869_v30, %v869_v30 }
 0x141   : > { %1621 = shalt.err (!%p1618_p8)
}
 0x142   : > { %1398 = dma.vmem_to_hbm [thread:$0]  (%p1784_p11), %s893_s30, 128, %s895_s5, %s875_s25   ;;  %873 = vst [vmem:[#allocation2] sm:$0xf] %v872_v31 }
 0x143 PF: > { %s920_s1 = sand.u32 1, %s1656_s15   ;;  %p2086_p4 = scmp.ge.s32.totalorder %s1668_s18, 2 }
 0x144   : > { %s921_s20 = scalar_lea.sflag [#allocation5], %s920_s1 }
 0x145   : > { %p1414_p9 = pnand %p2086_p4, %p1788_p12 }
 0x147   : > { %p1415_p1 = pneg %p1414_p9 }
 0x149   : > { %1647 = dma.done.wait (%p1415_p1), %s921_s20, 128  }
 0x14a   : > { %1649 = vsyncadd (%p1415_p1), %s921_s20, 4294967168  ;;  %s931_s7 = scalar_lea.sflag [#allocation11], %s920_s1 }
 0x14b   : > { %1651 = dma.done.wait (%p1415_p1), %s931_s7, 128  }
 0x14c   : > { %1653 = vsyncadd (%p1415_p1), %s931_s7, 4294967168  ;;  %p22_p11 = scmp.ge.s32.totalorder %s1720_s19, 4   ;;  %s2087_s15 = smov %s1660_s16 }
 0x14d   : > { %s2088_s16 = smov %s1664_s17  ;;  %s2089_s17 = smov %s1731_s22 }
 0x14e   : > { %s2090_s18 = smov %s1720_s19  ;;  %24 = sbr.rel (!%p22_p11) target bundleno = 11 (0xb), region = 114 }
 0x153   :  { %937 = vsyncpa [#allocation4], 1 }
 0x154   :  { %939 = vsyncpa [#allocation4 + $0x1], 1 }
 0x155   :  { %940 = vsyncpa [#allocation7], 1 }
 0x156   :  { %942 = vsyncpa [#allocation7 + $0x1], 1 }
 0x157   :  { %943 = vsyncpa [#allocation5], 1 }
 0x158   :  { %945 = vsyncpa [#allocation5 + $0x1], 1 }
 0x159   :  { %946 = vsyncpa [#allocation11], 1 }
 0x15a   :  { %948 = vsyncpa [#allocation11 + $0x1], 1 }

</bundles_post_ra>
